<compile_context>
chip_gen: v7x
topology: tpu7x:2x2x1
jax: 0.10.0
libtpu: 0.0.40
codegen_flags: <defaults>
</compile_context>

<pallas_src>
import jax
import jax.numpy as jnp
from jax.experimental import pallas as pl
from jax.experimental.pallas import tpu as pltpu


def _round_up(x, m):
    return ((x + m - 1) // m) * m


def decoder_kernel(z_ref, w1_ref, b1_ref, w2_ref, b2_ref, out_ref):
    # Hot path: two bf16 MXU matmuls with f32 accumulation, f32 VPU bias+relu,
    # EUP sigmoid (exp + reciprocal).
    z = z_ref[...].astype(jnp.bfloat16)                         # cast in VMEM
    h = jnp.dot(z, w1_ref[...], preferred_element_type=jnp.float32)
    h = jnp.maximum(h + b1_ref[...], 0.0)
    y = jnp.dot(h.astype(jnp.bfloat16), w2_ref[...],
                preferred_element_type=jnp.float32) + b2_ref[...]
    out_ref[...] = jax.nn.sigmoid(y).astype(out_ref.dtype)


def decoder_forward(z, w1, b1, w2, b2, *, batch_tile=512, out_dtype=jnp.float32):
    """z: (B, L) f32; w1: (L, H) bf16; b1: (1, H) f32; w2: (H, O) bf16;
    b2: (1, O) f32 (use prepare_params once).  Returns (B, O) in out_dtype."""
    B, L = z.shape
    H = w1.shape[1]
    O = w2.shape[1]

    # Batch tile: multiple of 8 sublanes; pick it so batches that are large
    # enough get >= 2 grid steps (v7x megacore sharding of the parallel axis).
    TB = min(batch_tile, max(8, _round_up(pl.cdiv(B, 2), 8)))
    TB = min(TB, _round_up(B, 8))
    grid = (pl.cdiv(B, TB),)

    out_bytes = jnp.dtype(out_dtype).itemsize
    # Explicit VMEM budget: double-buffered z/out, single-buffered weights,
    # in-kernel temporaries; capped at v7x's 64 MiB so one plan fits all gens.
    vmem_need = (2 * TB * L * 4 + 2 * TB * O * out_bytes
                 + (L * H + H * O) * 2 + (H + O) * 4
                 + TB * (2 * L + 6 * H + 4 * O))
    vmem_limit = min(max(2 * vmem_need, 32 << 20), 64 << 20)

    cost = pl.CostEstimate(
        flops=2 * B * (L * H + H * O),
        transcendentals=2 * B * O,          # sigmoid lowers to exp + reciprocal
        bytes_accessed=(B * L * 4 + (L * H + H * O) * 2 + (H + O) * 4
                        + B * O * out_bytes),
    )

    resident = dict(pipeline_mode=pl.Buffered(1))   # constant index_map blocks

    return pl.pallas_call(
        decoder_kernel,
        out_shape=jax.ShapeDtypeStruct((B, O), out_dtype),
        grid=grid,
        in_specs=[
            pl.BlockSpec((TB, L), lambda i: (i, 0)),              # z: streamed
            pl.BlockSpec((L, H), lambda i: (0, 0), **resident),   # resident W1
            pl.BlockSpec((1, H), lambda i: (0, 0), **resident),   # resident b1
            pl.BlockSpec((H, O), lambda i: (0, 0), **resident),   # resident W2
            pl.BlockSpec((1, O), lambda i: (0, 0), **resident),   # resident b2
        ],
        out_specs=pl.BlockSpec((TB, O), lambda i: (i, 0)),
        compiler_params=pltpu.CompilerParams(
            dimension_semantics=("parallel",),
            vmem_limit_bytes=vmem_limit,
        ),
        cost_estimate=cost,
    )(z, w1, b1, w2, b2)


def init_params(key, latent_dim, hidden_dim, output_dim):
    """Deterministic PyTorch-Linear-style uniform init (f32), weights pre-transposed."""
    k1, k2, k3, k4 = jax.random.split(key, 4)
    bound1 = 1.0 / (latent_dim ** 0.5)
    bound2 = 1.0 / (hidden_dim ** 0.5)
    w1 = jax.random.uniform(k1, (latent_dim, hidden_dim), jnp.float32, -bound1, bound1)
    b1 = jax.random.uniform(k2, (1, hidden_dim), jnp.float32, -bound1, bound1)
    w2 = jax.random.uniform(k3, (hidden_dim, output_dim), jnp.float32, -bound2, bound2)
    b2 = jax.random.uniform(k4, (1, output_dim), jnp.float32, -bound2, bound2)
    return w1, b1, w2, b2


def prepare_params(w1, b1, w2, b2):
    """One-time cast for the kernel (bf16 MXU weights, f32 biases).
    Do this at init / checkpoint-load time and cache — NOT per forward call."""
    return (jnp.asarray(w1, jnp.bfloat16),
            jnp.asarray(b1, jnp.float32).reshape(1, -1),
            jnp.asarray(w2, jnp.bfloat16),
            jnp.asarray(b2, jnp.float32).reshape(1, -1))


if __name__ == "__main__":
    latent_dim, hidden_dim, output_dim = 16, 32, 64
    batch = 8

    key = jax.random.PRNGKey(0)
    kz, kp = jax.random.split(key)
    z = jax.random.normal(kz, (batch, latent_dim), dtype=jnp.float32)
    w1, b1, w2, b2 = init_params(kp, latent_dim, hidden_dim, output_dim)
    params = prepare_params(w1, b1, w2, b2)   # cached once, reused every step

    out = jax.block_until_ready(decoder_forward(z, *params))

    # Cross-check against plain-JAX f32 reference (bf16 MXU operands -> relaxed
    # tolerance; outputs are post-sigmoid so the error is bounded).
    ref = jax.nn.sigmoid(jnp.maximum(z @ w1 + b1, 0.0) @ w2 + b2)
    assert out.shape == (batch, output_dim)
    assert jnp.allclose(out, ref, atol=5e-3, rtol=1e-2), float(jnp.max(jnp.abs(out - ref)))

    print("KERNEL_OK")
</pallas_src>

<mosaic_0001>
module attributes {stable_mosaic.version = 11 : i64} {
  func.func @decoder_kernel(%arg0: i32, %arg1: memref<8x16xf32, #tpu.memory_space<vmem>>, %arg2: memref<16x32xbf16, #tpu.memory_space<vmem>>, %arg3: memref<1x32xf32, #tpu.memory_space<vmem>>, %arg4: memref<32x64xbf16, #tpu.memory_space<vmem>>, %arg5: memref<1x64xf32, #tpu.memory_space<vmem>>, %arg6: memref<8x64xf32, #tpu.memory_space<vmem>>) attributes {dimension_semantics = [#tpu.dimension_semantics<parallel>], iteration_bounds = array<i64: 1>, scalar_prefetch = 0 : i64, scratch_operands = 0 : i64, tpu.core_type = #tpu.core_type<tc>, window_params = [{transform_indices = @transform_0, window_bounds = array<i64: 8, 16>}, {pipeline_mode = #tpu.pipeline_mode<synchronous>, transform_indices = @transform_1, window_bounds = array<i64: 16, 32>}, {pipeline_mode = #tpu.pipeline_mode<synchronous>, transform_indices = @transform_2, window_bounds = array<i64: 1, 32>}, {pipeline_mode = #tpu.pipeline_mode<synchronous>, transform_indices = @transform_3, window_bounds = array<i64: 32, 64>}, {pipeline_mode = #tpu.pipeline_mode<synchronous>, transform_indices = @transform_4, window_bounds = array<i64: 1, 64>}, {transform_indices = @transform_5, window_bounds = array<i64: 8, 64>}]} {
    %c0 = arith.constant 0 : index
    %c0_0 = arith.constant 0 : index
    %0 = vector.load %arg1[%c0, %c0_0] : memref<8x16xf32, #tpu.memory_space<vmem>>, vector<8x16xf32>
    %1 = arith.truncf %0 : vector<8x16xf32> to vector<8x16xbf16>
    %c0_1 = arith.constant 0 : index
    %c0_2 = arith.constant 0 : index
    %2 = vector.load %arg2[%c0_1, %c0_2] : memref<16x32xbf16, #tpu.memory_space<vmem>>, vector<16x32xbf16>
    %cst = arith.constant dense<0.000000e+00> : vector<8x32xf32>
    %3 = tpu.matmul %1, %2, %cst {dimension_numbers = #tpu.dot_dimension_numbers<[1], [0], [0], [1], [0, 0, 1, 1], [], []>} : vector<8x16xbf16>, vector<16x32xbf16>, vector<8x32xf32> -> vector<8x32xf32>
    %c0_3 = arith.constant 0 : index
    %c0_4 = arith.constant 0 : index
    %4 = vector.load %arg3[%c0_3, %c0_4] : memref<1x32xf32, #tpu.memory_space<vmem>>, vector<1x32xf32>
    %5 = vector.broadcast %4 : vector<1x32xf32> to vector<8x32xf32>
    %6 = arith.addf %3, %5 : vector<8x32xf32>
    %cst_5 = arith.constant 0.000000e+00 : f32
    %7 = vector.broadcast %cst_5 : f32 to vector<8x32xf32>
    %8 = arith.maximumf %6, %7 : vector<8x32xf32>
    %9 = arith.truncf %8 : vector<8x32xf32> to vector<8x32xbf16>
    %c0_6 = arith.constant 0 : index
    %c0_7 = arith.constant 0 : index
    %10 = vector.load %arg4[%c0_6, %c0_7] : memref<32x64xbf16, #tpu.memory_space<vmem>>, vector<32x64xbf16>
    %cst_8 = arith.constant dense<0.000000e+00> : vector<8x64xf32>
    %11 = tpu.matmul %9, %10, %cst_8 {dimension_numbers = #tpu.dot_dimension_numbers<[1], [0], [0], [1], [0, 0, 1, 1], [], []>} : vector<8x32xbf16>, vector<32x64xbf16>, vector<8x64xf32> -> vector<8x64xf32>
    %c0_9 = arith.constant 0 : index
    %c0_10 = arith.constant 0 : index
    %12 = vector.load %arg5[%c0_9, %c0_10] : memref<1x64xf32, #tpu.memory_space<vmem>>, vector<1x64xf32>
    %13 = vector.broadcast %12 : vector<1x64xf32> to vector<8x64xf32>
    %14 = arith.addf %11, %13 : vector<8x64xf32>
    %15 = arith.negf %14 : vector<8x64xf32>
    %16 = math.exp %15 : vector<8x64xf32>
    %cst_11 = arith.constant 1.000000e+00 : f32
    %17 = vector.broadcast %cst_11 : f32 to vector<8x64xf32>
    %18 = arith.addf %17, %16 : vector<8x64xf32>
    %19 = arith.divf %17, %18 : vector<8x64xf32>
    %c0_12 = arith.constant 0 : index
    %c0_13 = arith.constant 0 : index
    %20 = vector.load %arg6[%c0_12, %c0_13] : memref<8x64xf32, #tpu.memory_space<vmem>>, vector<8x64xf32>
    tpu.vector_store %arg6[%c0_12, %c0_13], %19 {strides = array<i32>} : memref<8x64xf32, #tpu.memory_space<vmem>>, vector<8x64xf32>,
    return
  }
  func.func @transform_0(%arg0: i32) -> (i32, i32) {
    %c0_i32 = arith.constant 0 : i32
    %c0_i32_0 = arith.constant 0 : i32
    return %arg0, %c0_i32 : i32, i32
  }
  func.func @transform_1(%arg0: i32) -> (i32, i32) {
    %c0_i32 = arith.constant 0 : i32
    %c0_i32_0 = arith.constant 0 : i32
    %c0_i32_1 = arith.constant 0 : i32
    return %c0_i32, %c0_i32_0 : i32, i32
  }
  func.func @transform_2(%arg0: i32) -> (i32, i32) {
    %c0_i32 = arith.constant 0 : i32
    %c0_i32_0 = arith.constant 0 : i32
    %c0_i32_1 = arith.constant 0 : i32
    return %c0_i32, %c0_i32_0 : i32, i32
  }
  func.func @transform_3(%arg0: i32) -> (i32, i32) {
    %c0_i32 = arith.constant 0 : i32
    %c0_i32_0 = arith.constant 0 : i32
    %c0_i32_1 = arith.constant 0 : i32
    return %c0_i32, %c0_i32_0 : i32, i32
  }
  func.func @transform_4(%arg0: i32) -> (i32, i32) {
    %c0_i32 = arith.constant 0 : i32
    %c0_i32_0 = arith.constant 0 : i32
    %c0_i32_1 = arith.constant 0 : i32
    return %c0_i32, %c0_i32_0 : i32, i32
  }
  func.func @transform_5(%arg0: i32) -> (i32, i32) {
    %c0_i32 = arith.constant 0 : i32
    %c0_i32_0 = arith.constant 0 : i32
    return %arg0, %c0_i32 : i32, i32
  }
}

</mosaic_0001>

<bundles_post_ra>
// kernel: tpu_custom_call.1
= control target key start
LH: loop header
LB: loop body
LE: loop exit
PB: predicated region body
PF: predicated region fallthrough
CT: control target
= control target key end

     0   :  { %10 = vsyncpa [#allocation3], 0  ;;  %s449_s0 = inlined_call_operand.hbm [shape: f32[8,16], index: 0, kind: input, shape index: {}]   ;;  %s450_s1 = inlined_call_operand.hbm [shape: bf16[16,32], index: 1, kind: input, shape index: {}]   ;;  %s451_s2 = inlined_call_operand.vmem [shape: f32[1,32], index: 2, kind: input, shape index: {}]   ;;  %s452_s3 = inlined_call_operand.hbm [shape: bf16[32,64], index: 3, kind: input, shape index: {}]   ;;  %s453_s4 = inlined_call_operand.vmem [shape: f32[1,64], index: 4, kind: input, shape index: {}]   ;;  %s454_s5 = inlined_call_operand.hbm [shape: f32[8,64], index: 5, kind: output, shape index: {}]  }
   0x1   :  { %11 = vsyncpa [#allocation6], 0 }
   0x2   :  { %12 = vsyncpa [#allocation4], 0  ;;  %s351_s18 = smov [#allocation5]   ;;  %s257_s22 = scalar_lea.hbm %s450_s1, 128 }
   0x3   :  { %s28_s19 = sshll.u32 %s351_s18, 4  ;;  %p258_p0 = scmp.ne.s32.totalorder %s450_s1, %s257_s22  ;;  %s29_s19 = int_to_ptr.vmem [resolvable:$true] %s28_s19 }
   0x4   :  { %p261_p1 = scmp.lt.u32.totalorder %s257_s22, %s450_s1 }
   0x6   :  { %p263_p2 = pnand %p261_p1, %p258_p0 }
   0x8   :  { %266 = shalt.err (!%p263_p2)
}
   0x9   :  { %s267_s27 = scalar_lea.vmem %s29_s19, 128  ;;  %p272_p4 = scmp.lt.s32.totalorder %s29_s19, %s29_s19 }
   0xa   :  { %p268_p3 = scmp.ne.s32.totalorder %s29_s19, %s267_s27  ;;  %p273_p5 = scmp.lt.s32.totalorder %s267_s27, %s267_s27 }
   0xc   :  { %p274_p6 = por %p273_p5, %p272_p4 }
   0xe   :  { %p275_p7 = pnand %p274_p6, %p268_p3 }
  0x10   :  { %278 = shalt.err (!%p275_p7)
}
  0x11   :  { %s352_s28 = smov 64   ;;  %s353_s29 = smov 4  }
  0x12   :  { %34 = dma.hbm_to_vmem [thread:$0]  %s450_s1, 128, %s29_s19, [#allocation6], %s352_s28, %s352_s28, %s353_s29  }
  0x13   :  { %s354_s7 = smov [#allocation2]   ;;  %s355_s9 = smov [#allocation7]  }
  0x14   :  { %s19_s8 = sshll.u32 %s354_s7, 4  ;;  %s42_s10 = sshll.u32 %s355_s9, 4  ;;  %s20_s8 = int_to_ptr.vmem [resolvable:$true] %s19_s8  ;;  %s43_s10 = int_to_ptr.vmem [resolvable:$true] %s42_s10 }
  0x15   :  { %s279_s13 = scalar_lea.hbm %s449_s0, 128 }
  0x16   :  { %p280_p8 = scmp.ne.s32.totalorder %s449_s0, %s279_s13  ;;  %p283_p9 = scmp.lt.u32.totalorder %s279_s13, %s449_s0 }
  0x18   :  { %p285_p10 = pnand %p283_p9, %p280_p8 }
  0x1a   :  { %288 = shalt.err (!%p285_p10)
}
  0x1b   :  { %s289_s1 = scalar_lea.vmem %s20_s8, 128  ;;  %p294_p12 = scmp.lt.s32.totalorder %s20_s8, %s20_s8 }
  0x1c   :  { %p290_p11 = scmp.ne.s32.totalorder %s20_s8, %s289_s1  ;;  %p295_p13 = scmp.lt.s32.totalorder %s289_s1, %s289_s1 }
  0x1e   :  { %p296_p0 = por %p295_p13, %p294_p12 }
  0x20   :  { %p297_p1 = pnand %p296_p0, %p290_p11 }
  0x22   :  { %300 = shalt.err (!%p297_p1)
}
  0x23   :  { %22 = dma.hbm_to_vmem [thread:$0]  %s449_s0, 128, %s20_s8, [#allocation3]  }
  0x24   :  { %s301_s22 = scalar_lea.hbm %s452_s3, 256 }
  0x25   :  { %p302_p2 = scmp.ne.s32.totalorder %s452_s3, %s301_s22  ;;  %p305_p3 = scmp.lt.u32.totalorder %s301_s22, %s452_s3 }
  0x27   :  { %p307_p4 = pnand %p305_p3, %p302_p2 }
  0x29   :  { %310 = shalt.err (!%p307_p4)
}
  0x2a   :  { %s311_s27 = scalar_lea.vmem %s43_s10, 256  ;;  %p316_p6 = scmp.lt.s32.totalorder %s43_s10, %s43_s10 }
  0x2b   :  { %p312_p5 = scmp.ne.s32.totalorder %s43_s10, %s311_s27  ;;  %p317_p7 = scmp.lt.s32.totalorder %s311_s27, %s311_s27 }
  0x2d   :  { %p318_p8 = por %p317_p7, %p316_p6 }
  0x2f   :  { %p319_p9 = pnand %p318_p8, %p312_p5 }
  0x31   :  { %322 = shalt.err (!%p319_p9)
}
  0x32   :  { %48 = dma.hbm_to_vmem [thread:$0]  %s452_s3, 256, %s43_s10, [#allocation6], %s352_s28, %s352_s28, %s353_s29  }
  0x33   :  { %345 = dma.done.wait [#allocation3], 128  }
  0x34   :  { %346 = vsyncadd [#allocation3], 4294967168 }
  0x35   :  { %347 = dma.done.wait [#allocation6], 384  }
  0x36   :  { %348 = vsyncadd [#allocation6], 4294966912  ;;  %v356_v0 = vmov 0.0   ;;  %vm357_vm0 = vmmov 0   ;;  %v250_v1 = vld [vmem:[#allocation5] sm:$0xff]   ;;  %v61_v2 = vld [vmem:[#allocation2] sm:$0xff] }
  0x37   :  { %228 = vmatprep.subr.bf16.mxu0 %v356_v0  ;;  %230 = vmatprep.mubr.msk.bf16.mxu0 %vm357_vm0, %v356_v0  ;;  %vm78_vm1 = vcmask 130048   ;;  %v62_v3 = vpack.c.bf16 %v61_v2, %v61_v2  ;;  %v251_v4 = vld [vmem:[#allocation7] sm:$0xff]   ;;  %v252_v5 = vld [vmem:[#allocation7 + $0x8] sm:$0xff]   ;;  %v215_v6 = vld [vmem:[%s451_s2] ss:$0 sm:$0xff]  ;;  %vm147_vm2 = vcmask 261120  }
  0x38   :  { %234 = vmatprep.subr.bf16.mxu1 %v356_v0  ;;  %238 = vmatprep.mubr.msk.bf16.mxu1 %vm357_vm0, %v356_v0  ;;  %v218_v14 = vld [vmem:[%s453_s4] ss:$0 sm:$0xff]  ;;  %s358_s2 = smov [#allocation8]   ;;  %vm197_vm3 = vcmask 523264  }
  0x39   :  { %229 = vmatpush3.bf16.msra.mxu0 %v250_v1  ;;  %235 = vmatpush3.bf16.msra.mxu1 %v251_v4  ;;  %s205_s7 = sshll.u32 %s358_s2, 4  ;;  %s206_s7 = int_to_ptr.vmem [resolvable:$true] %s205_s7 }
  0x3a   :  { %236 = vmatprep.subr.bf16.mxu1 %v356_v0  ;;  %s323_s8 = scalar_lea.vmem %s206_s7, 128  ;;  %p328_p11 = scmp.lt.s32.totalorder %s206_s7, %s206_s7 }
  0x3b   :  { %p324_p10 = scmp.ne.s32.totalorder %s206_s7, %s323_s8  ;;  %p329_p12 = scmp.lt.s32.totalorder %s323_s8, %s323_s8 }
  0x3c   :  { %231 = vmatmul.mubr.msk.bf16.vlgmr.msra.gmra.mrb[0].mxu0 %vm78_vm1, %v62_v3 }
  0x3d   :  { %237 = vmatpush3.bf16.msra.mxu1 %v252_v5  ;;  %p330_p13 = por %p329_p12, %p328_p11 }
  0x3f   :  { %p331_p0 = pnand %p330_p13, %p324_p10 }
 0x10f   :  { %v116_v7 = vpop.f32.mrb[0].mxu0 }
 0x110   :  { %v117_v8 = vadd.f32 %v215_v6, %v116_v7  ;;  %v232_v9 = vpop.f32.mrb[1].mxu0 }
 0x111   :  { %v119_v10 = vpop.f32.mrb[2].mxu0 }
 0x112   :  { %v122_v11 = vmax.f32 %v117_v8, 0.0  ;;  %v233_v12 = vpop.f32.mrb[3].mxu0 }
 0x114   :  { %v123_v13 = vpack.c.bf16 %v122_v11, %v122_v11 }
 0x116   :  { %239 = vmatmul.mubr.msk.bf16.vlgmr.msra.gmra.mrb[0].mxu1 %vm147_vm2, %v123_v13 }
 0x1e9   :  { %v185_v15 = vpop.f32.mrb[0].mxu1 }
 0x1ea   :  { %v186_v16 = vadd.f32 %v218_v14, %v185_v15  ;;  %v240_v17 = vpop.f32.mrb[1].mxu1 }
 0x1eb   :  { %v188_v18 = vpop.f32.mrb[2].mxu1 }
 0x1ec   :  { %v222_v19 = vmul.f32 -1.442695, %v186_v16  ;;  %v241_v20 = vpop.f32.mrb[3].mxu1 }
 0x1ee   :  { %253 = vpow2.f32 %v222_v19 }
 0x1f8   :  { %v254_v21 = vpop.eup %253 }
 0x1f9   :  { %v194_v22 = vadd.f32 1.0, %v254_v21 }
 0x1fb   :  { %255 = vrcp.f32 %v194_v22 }
 0x205   :  { %v256_v23 = vpop.eup %255 }
 0x206   :  { %198 = vst.msk [vmem:[#allocation8] sm:$0xff] %vm197_vm3, %v256_v23 }
 0x207   :  { %334 = shalt.err (!%p331_p0)
}
 0x208   :  { %s335_s10 = scalar_lea.hbm %s454_s5, 128 }
 0x209   :  { %p336_p1 = scmp.ne.s32.totalorder %s454_s5, %s335_s10  ;;  %p339_p2 = scmp.lt.u32.totalorder %s335_s10, %s454_s5 }
 0x20b   :  { %p341_p3 = pnand %p339_p2, %p336_p1 }
 0x20d   :  { %344 = shalt.err (!%p341_p3)
}
 0x20e   :  { %208 = dma.vmem_to_hbm [thread:$0]  %s206_s7, 128, %s454_s5, [#allocation4]  }
 0x20f   :  { %349 = dma.done.wait [#allocation4], 128  }
 0x210   :  { %350 = vsyncadd [#allocation4], 4294967168 }
 0x211   :  { %212 = vsyncpa [#allocation3], 1 }
 0x212   :  { %213 = vsyncpa [#allocation6], 1 }
 0x213   :  { %214 = vsyncpa [#allocation4], 1 }

</bundles_post_ra>
